<compile_context>
chip_gen: v7x
topology: tpu7x:2x2x1
jax: 0.10.0
libtpu: 0.0.40
codegen_flags: <defaults>
</compile_context>

<pallas_src>
import jax
import jax.numpy as jnp
from jax import lax
from jax.experimental import pallas as pl
from jax.experimental.pallas import tpu as pltpu

EPS = 1e-5

_TARGET_BLOCK_BYTES = 2 * 1024 * 1024   # aim for ~0.5–2 MiB x-blocks
_MIN_BLOCK_BYTES = 256 * 1024           # don't shrink blocks below this just for grid shape


# ----------------------------------------------------------------------------
# VMEM budgeting (generation aware)
# ----------------------------------------------------------------------------
def _vmem_budget_and_limit():
    """Returns (tile-sizing budget, vmem_limit_bytes to request).

    v7x: 64 MiB physical -> limit 32 MiB, budget 24 MiB.
    v5e/v6e: 128 MiB physical -> limit 64 MiB (raises v5e's 16 MiB scoped
    default), budget 48 MiB.
    """
    cap = 64 * 1024 * 1024  # conservative default = v7x physical VMEM
    try:
        info = pltpu.get_tpu_info()
        cap = int(getattr(info, "vmem_capacity_bytes", cap))
    except Exception:
        pass
    limit = min(cap // 2, 64 * 1024 * 1024)
    budget = (limit * 3) // 4
    return budget, limit


# ----------------------------------------------------------------------------
# Tile pickers
# ----------------------------------------------------------------------------
def _pick_tile_h(b, h, itemsize, budget):
    """Lane-dense feature tile for the fused (full-batch) path.

    Largest multiple-of-128 divisor of H whose double-buffered in/out blocks
    (+ f32 temporaries + params) fit `budget`, capped near the ~2 MiB block
    sweet spot, preferring a grid of >= 2 even tiles (v7x's two TensorCores).
    Returns None if H is irregular or even a (B, 128) block does not fit
    (caller falls back to the batch-tiled two-pass path).
    """
    if h % 128 != 0:
        return None

    def block_bytes(t):
        return b * t * itemsize

    def vmem_bytes(t):
        # 2x-buffered x-in + out, ~2 f32 working copies of the tile, params.
        return 4 * block_bytes(t) + 2 * b * t * 4 + 8 * t * 4

    cands = [t for t in range(128, h + 1, 128)
             if h % t == 0 and vmem_bytes(t) <= budget]
    if not cands:
        return None

    capped = [t for t in cands if block_bytes(t) <= _TARGET_BLOCK_BYTES]
    pool = capped if capped else [min(cands)]
    best = max(pool)

    # Prefer >= 2 (even) tiles so "parallel" semantics shard across v7x's two
    # TCs — but never at the cost of absurdly small blocks.
    floor_bytes = min(_MIN_BLOCK_BYTES, block_bytes(best) // 2)
    even = [t for t in pool
            if (h // t) >= 2 and (h // t) % 2 == 0
            and block_bytes(t) >= floor_bytes]
    return max(even) if even else best


def _divisor_multiples(n, unit):
    """Divisors of n that are multiples of `unit` (ascending)."""
    return [d for d in range(unit, n + 1, unit) if n % d == 0]


def _pick_fallback_tiles(b, h, itemsize, budget):
    """(tile_b, tile_h) for the batch-tiled two-pass path."""
    if h % 128 == 0:
        h_cands = _divisor_multiples(h, 128)
        small = [t for t in h_cands if t <= 512]
        tile_h = max(small) if small else min(h_cands)
    else:
        tile_h = h  # irregular: block must span the full feature axis

    b_cands = _divisor_multiples(b, 8) or [b]

    def vmem_ok(tb):
        blk = tb * tile_h * itemsize
        return 4 * blk + 2 * tb * tile_h * 4 + 8 * tile_h * 4 <= budget

    fitting = [tb for tb in b_cands if vmem_ok(tb)]
    if not fitting:
        # TODO(synk): pathological shape (giant irregular row) — take the
        # smallest batch tile anyway and rely on the raised vmem limit.
        return min(b_cands), tile_h
    capped = [tb for tb in fitting if tb * tile_h * itemsize <= _TARGET_BLOCK_BYTES]
    return (max(capped) if capped else min(fitting)), tile_h


# ----------------------------------------------------------------------------
# Kernels
# ----------------------------------------------------------------------------
def _bn_fused_kernel(x_ref, gamma_ref, beta_ref, o_ref):
    """One (B, TILE_H) feature slab: full-batch norm over the sublane axis."""
    xf = x_ref[...].astype(jnp.float32)                 # (B, TILE_H)
    inv_b = jnp.float32(1.0 / x_ref.shape[0])           # static

    # Single pass: both cross-sublane reductions go back-to-back on the XLU.
    s = jnp.sum(xf, axis=0, keepdims=True)              # (1, TILE_H)
    ss = jnp.sum(xf * xf, axis=0, keepdims=True)        # (1, TILE_H)
    mean = s * inv_b
    var = jnp.maximum(ss * inv_b - mean * mean, 0.0)     # cancellation guard
    inv_std = lax.rsqrt(var + EPS)                       # EUP slot

    gamma = gamma_ref[...].astype(jnp.float32)           # (1, TILE_H)
    beta = beta_ref[...].astype(jnp.float32)
    scale = inv_std * gamma
    shift = beta - mean * scale

    # f32 multiply-add tail; single cast at the store (bf16 stores still halve
    # HBM write traffic; avoids the v5e bf16-VPU pitfall and bf16 rounding of
    # scale/shift).
    o_ref[...] = (xf * scale + shift).astype(o_ref.dtype)


def _bn_stats_kernel(x_ref, s_ref, ss_ref):
    """Accumulate per-feature sum / sum-of-squares over batch tiles."""
    k = pl.program_id(1)  # batch-tile index (reduction axis, last)

    @pl.when(k == 0)
    def _():
        s_ref[...] = jnp.zeros_like(s_ref)
        ss_ref[...] = jnp.zeros_like(ss_ref)

    xf = x_ref[...].astype(jnp.float32)
    s_ref[...] += jnp.sum(xf, axis=0, keepdims=True)
    ss_ref[...] += jnp.sum(xf * xf, axis=0, keepdims=True)


def _bn_apply_kernel(x_ref, scale_ref, shift_ref, o_ref):
    """Elementwise y = x*scale + shift on a (TILE_B, TILE_H) block."""
    xf = x_ref[...].astype(jnp.float32)
    o_ref[...] = (xf * scale_ref[...] + shift_ref[...]).astype(o_ref.dtype)


# ----------------------------------------------------------------------------
# Wrappers
# ----------------------------------------------------------------------------
def _bn_fused(x, gamma2d, beta2d, tile_h, vmem_limit):
    b, h = x.shape
    if tile_h is None:
        # Small / irregular H: a single full-array block (no (8,128) constraint
        # since the block equals the full dims).
        grid = (1,)
        x_spec = pl.BlockSpec((b, h), lambda j: (0, 0))
        p_spec = pl.BlockSpec((1, h), lambda j: (0, 0))
    else:
        grid = (h // tile_h,)
        x_spec = pl.BlockSpec((b, tile_h), lambda j: (0, j))
        p_spec = pl.BlockSpec((1, tile_h), lambda j: (0, j))

    return pl.pallas_call(
        _bn_fused_kernel,
        out_shape=jax.ShapeDtypeStruct((b, h), x.dtype),
        grid=grid,
        in_specs=[x_spec, p_spec, p_spec],
        out_specs=x_spec,
        compiler_params=pltpu.CompilerParams(
            dimension_semantics=("parallel",),  # independent feature tiles
            vmem_limit_bytes=vmem_limit),
    )(x, gamma2d, beta2d)


def _bn_two_pass(x, gamma2d, beta2d, tile_b, tile_h, vmem_limit):
    """Batch-tiled path for large B (or huge irregular-H rows)."""
    b, h = x.shape
    grid = (h // tile_h, b // tile_b)
    x_spec = pl.BlockSpec((tile_b, tile_h), lambda j, k: (k, j))
    row_spec = pl.BlockSpec((1, tile_h), lambda j, k: (0, j))

    # Pass 1: per-feature sum / sum-of-squares (reduction over the batch axis).
    s, ss = pl.pallas_call(
        _bn_stats_kernel,
        out_shape=(jax.ShapeDtypeStruct((1, h), jnp.float32),
                   jax.ShapeDtypeStruct((1, h), jnp.float32)),
        grid=grid,
        in_specs=[x_spec],
        out_specs=(row_spec, row_spec),
        compiler_params=pltpu.CompilerParams(
            dimension_semantics=("parallel", "arbitrary"),
            vmem_limit_bytes=vmem_limit),
    )(x)

    # Tiny (1, H) math stays in plain XLA.
    inv_b = jnp.float32(1.0 / b)
    mean = s * inv_b
    var = jnp.maximum(ss * inv_b - mean * mean, 0.0)
    scale = lax.rsqrt(var + EPS) * gamma2d
    shift = beta2d - mean * scale

    # Pass 2: streaming apply, all tiles independent.
    return pl.pallas_call(
        _bn_apply_kernel,
        out_shape=jax.ShapeDtypeStruct((b, h), x.dtype),
        grid=grid,
        in_specs=[x_spec, row_spec, row_spec],
        out_specs=x_spec,
        compiler_params=pltpu.CompilerParams(
            dimension_semantics=("parallel", "parallel"),
            vmem_limit_bytes=vmem_limit),
    )(x, scale, shift)


def batchnorm_skipping_nn(x, gamma, beta):
    """Forward pass of BatchNormSkippingNN.

    x:     (B, H) float array
    gamma: (H,)   batchnorm weight
    beta:  (H,)   batchnorm bias
    """
    b, h = x.shape
    if b == 1:
        # Module skips the BatchNorm entirely for batch size 1.
        return x

    gamma2d = gamma.reshape(1, h).astype(jnp.float32)
    beta2d = beta.reshape(1, h).astype(jnp.float32)

    budget, limit = _vmem_budget_and_limit()
    itemsize = x.dtype.itemsize

    # Main path: lane-dense feature tiling with the full batch per block.
    tile_h = _pick_tile_h(b, h, itemsize, budget)
    if tile_h is not None:
        return _bn_fused(x, gamma2d, beta2d, tile_h, limit)

    # Irregular H: a single full-array block if it fits the budget.
    if h % 128 != 0:
        full_bytes = 4 * b * h * itemsize + 2 * b * h * 4 + 8 * h * 4
        if full_bytes <= budget:
            return _bn_fused(x, gamma2d, beta2d, None, limit)

    # Very large B (or huge irregular rows): batch-tiled two-pass path.
    tile_b, tile_h2 = _pick_fallback_tiles(b, h, itemsize, budget)
    return _bn_two_pass(x, gamma2d, beta2d, tile_b, tile_h2, limit)


# ----------------------------------------------------------------------------
# Self-test
# ----------------------------------------------------------------------------
if __name__ == "__main__":
    key = jax.random.PRNGKey(0)
    keys = jax.random.split(key, 12)

    def ref_bn(x, gamma, beta):
        xf = x.astype(jnp.float32)
        mean = jnp.mean(xf, axis=0, keepdims=True)
        var = jnp.mean((xf - mean) ** 2, axis=0, keepdims=True)
        return (xf - mean) / jnp.sqrt(var + EPS) * gamma[None, :] + beta[None, :]

    # 1) Tiny shape consistent with the module (irregular H -> full-block path).
    B, H = 8, 32
    x = jax.random.normal(keys[0], (B, H), dtype=jnp.float32)
    gamma = 1.0 + 0.1 * jax.random.normal(keys[1], (H,), dtype=jnp.float32)
    beta = 0.1 * jax.random.normal(keys[2], (H,), dtype=jnp.float32)
    out = jax.block_until_ready(batchnorm_skipping_nn(x, gamma, beta))
    assert jnp.allclose(out, ref_bn(x, gamma, beta), atol=1e-4, rtol=1e-4), \
        "mismatch vs reference (small / full-block path)"

    # 2) Lane-dense shape exercising the fused, tiled, 'parallel' H-axis path
    #    (H=1024 -> even grid of 2 tiles).
    B2, H2 = 8, 1024
    x2 = jax.random.normal(keys[3], (B2, H2), dtype=jnp.float32)
    gamma2 = 1.0 + 0.1 * jax.random.normal(keys[4], (H2,), dtype=jnp.float32)
    beta2 = 0.1 * jax.random.normal(keys[5], (H2,), dtype=jnp.float32)
    out2 = jax.block_until_ready(batchnorm_skipping_nn(x2, gamma2, beta2))
    assert jnp.allclose(out2, ref_bn(x2, gamma2, beta2), atol=1e-4, rtol=1e-4), \
        "mismatch vs reference (fused tiled path)"

    # 3) batch-size-1 skip path must return x unchanged.
    x1 = x[:1]
    out1 = jax.block_until_ready(batchnorm_skipping_nn(x1, gamma, beta))
    assert jnp.array_equal(out1, x1), "b==1 path must return x unchanged"

    # 4) Directly exercise the batch-tiled two-pass fallback at small shapes.
    B4, H4 = 16, 256
    x4 = jax.random.normal(keys[6], (B4, H4), dtype=jnp.float32)
    gamma4 = 1.0 + 0.1 * jax.random.normal(keys[7], (H4,), dtype=jnp.float32)
    beta4 = 0.1 * jax.random.normal(keys[8], (H4,), dtype=jnp.float32)
    _, limit = _vmem_budget_and_limit()
    out4 = jax.block_until_ready(
        _bn_two_pass(x4, gamma4.reshape(1, -1), beta4.reshape(1, -1),
                     tile_b=8, tile_h=128, vmem_limit=limit))
    assert jnp.allclose(out4, ref_bn(x4, gamma4, beta4), atol=1e-4, rtol=1e-4), \
        "mismatch vs reference (two-pass batch-tiled path)"

    # 5) bf16 I/O tolerance test (f32 tail, single cast at the store).
    B5, H5 = 8, 512
    x5 = jax.random.normal(keys[9], (B5, H5), dtype=jnp.float32).astype(jnp.bfloat16)
    gamma5 = 1.0 + 0.1 * jax.random.normal(keys[10], (H5,), dtype=jnp.float32)
    beta5 = 0.1 * jax.random.normal(keys[11], (H5,), dtype=jnp.float32)
    out5 = jax.block_until_ready(batchnorm_skipping_nn(x5, gamma5, beta5))
    ref5 = ref_bn(x5.astype(jnp.float32), gamma5, beta5)
    assert jnp.allclose(out5.astype(jnp.float32), ref5, atol=5e-2, rtol=5e-2), \
        "mismatch vs reference (bf16 path)"

    print("KERNEL_OK")
</pallas_src>

<mosaic_0001>
module attributes {stable_mosaic.version = 11 : i64} {
  func.func @_bn_fused_kernel(%arg0: i32, %arg1: memref<8x32xf32, #tpu.memory_space<vmem>>, %arg2: memref<1x32xf32, #tpu.memory_space<vmem>>, %arg3: memref<1x32xf32, #tpu.memory_space<vmem>>, %arg4: memref<8x32xf32, #tpu.memory_space<vmem>>) attributes {dimension_semantics = [#tpu.dimension_semantics<parallel>], iteration_bounds = array<i64: 1>, scalar_prefetch = 0 : i64, scratch_operands = 0 : i64, tpu.core_type = #tpu.core_type<tc>, window_params = [{pipeline_mode = #tpu.pipeline_mode<synchronous>, transform_indices = @transform_0, window_bounds = array<i64: 8, 32>}, {pipeline_mode = #tpu.pipeline_mode<synchronous>, transform_indices = @transform_1, window_bounds = array<i64: 1, 32>}, {pipeline_mode = #tpu.pipeline_mode<synchronous>, transform_indices = @transform_2, window_bounds = array<i64: 1, 32>}, {pipeline_mode = #tpu.pipeline_mode<synchronous>, transform_indices = @transform_3, window_bounds = array<i64: 8, 32>}]} {
    %c0 = arith.constant 0 : index
    %c0_0 = arith.constant 0 : index
    %0 = vector.load %arg1[%c0, %c0_0] : memref<8x32xf32, #tpu.memory_space<vmem>>, vector<8x32xf32>
    %cst = arith.constant dense<0.000000e+00> : vector<32xf32>
    %1 = vector.multi_reduction <add>, %0, %cst [0] : vector<8x32xf32> to vector<32xf32>
    %2 = vector.shape_cast %1 : vector<32xf32> to vector<1x32xf32>
    %3 = arith.mulf %0, %0 : vector<8x32xf32>
    %cst_1 = arith.constant dense<0.000000e+00> : vector<32xf32>
    %4 = vector.multi_reduction <add>, %3, %cst_1 [0] : vector<8x32xf32> to vector<32xf32>
    %5 = vector.shape_cast %4 : vector<32xf32> to vector<1x32xf32>
    %cst_2 = arith.constant 1.250000e-01 : f32
    %6 = vector.broadcast %cst_2 : f32 to vector<1x32xf32>
    %7 = arith.mulf %2, %6 : vector<1x32xf32>
    %cst_3 = arith.constant 1.250000e-01 : f32
    %8 = vector.broadcast %cst_3 : f32 to vector<1x32xf32>
    %9 = arith.mulf %5, %8 : vector<1x32xf32>
    %10 = arith.mulf %7, %7 : vector<1x32xf32>
    %11 = arith.subf %9, %10 : vector<1x32xf32>
    %cst_4 = arith.constant 0.000000e+00 : f32
    %12 = vector.broadcast %cst_4 : f32 to vector<1x32xf32>
    %13 = arith.maximumf %11, %12 : vector<1x32xf32>
    %cst_5 = arith.constant 9.99999974E-6 : f32
    %14 = vector.broadcast %cst_5 : f32 to vector<1x32xf32>
    %15 = arith.addf %13, %14 : vector<1x32xf32>
    %16 = math.rsqrt %15 : vector<1x32xf32>
    %c0_6 = arith.constant 0 : index
    %c0_7 = arith.constant 0 : index
    %17 = vector.load %arg2[%c0_6, %c0_7] : memref<1x32xf32, #tpu.memory_space<vmem>>, vector<1x32xf32>
    %c0_8 = arith.constant 0 : index
    %c0_9 = arith.constant 0 : index
    %18 = vector.load %arg3[%c0_8, %c0_9] : memref<1x32xf32, #tpu.memory_space<vmem>>, vector<1x32xf32>
    %19 = arith.mulf %16, %17 : vector<1x32xf32>
    %20 = arith.mulf %7, %19 : vector<1x32xf32>
    %21 = arith.subf %18, %20 : vector<1x32xf32>
    %22 = vector.broadcast %19 : vector<1x32xf32> to vector<8x32xf32>
    %23 = arith.mulf %0, %22 : vector<8x32xf32>
    %24 = vector.broadcast %21 : vector<1x32xf32> to vector<8x32xf32>
    %25 = arith.addf %23, %24 : vector<8x32xf32>
    %c0_10 = arith.constant 0 : index
    %c0_11 = arith.constant 0 : index
    %26 = vector.load %arg4[%c0_10, %c0_11] : memref<8x32xf32, #tpu.memory_space<vmem>>, vector<8x32xf32>
    tpu.vector_store %arg4[%c0_10, %c0_11], %25 {strides = array<i32>} : memref<8x32xf32, #tpu.memory_space<vmem>>, vector<8x32xf32>,
    return
  }
  func.func @transform_0(%arg0: i32) -> (i32, i32) {
    %c0_i32 = arith.constant 0 : i32
    %c0_i32_0 = arith.constant 0 : i32
    %c0_i32_1 = arith.constant 0 : i32
    return %c0_i32, %c0_i32_0 : i32, i32
  }
  func.func @transform_1(%arg0: i32) -> (i32, i32) {
    %c0_i32 = arith.constant 0 : i32
    %c0_i32_0 = arith.constant 0 : i32
    %c0_i32_1 = arith.constant 0 : i32
    return %c0_i32, %c0_i32_0 : i32, i32
  }
  func.func @transform_2(%arg0: i32) -> (i32, i32) {
    %c0_i32 = arith.constant 0 : i32
    %c0_i32_0 = arith.constant 0 : i32
    %c0_i32_1 = arith.constant 0 : i32
    return %c0_i32, %c0_i32_0 : i32, i32
  }
  func.func @transform_3(%arg0: i32) -> (i32, i32) {
    %c0_i32 = arith.constant 0 : i32
    %c0_i32_0 = arith.constant 0 : i32
    %c0_i32_1 = arith.constant 0 : i32
    return %c0_i32, %c0_i32_0 : i32, i32
  }
}

</mosaic_0001>

<bundles_post_ra>
// kernel: tpu_custom_call.1
= control target key start
LH: loop header
LB: loop body
LE: loop exit
PB: predicated region body
PF: predicated region fallthrough
CT: control target
= control target key end

     0   :  { %8 = vsyncpa [#allocation3], 0  ;;  %s191_s0 = inlined_call_operand.hbm [shape: f32[8,32], index: 0, kind: input, shape index: {}]   ;;  %s192_s1 = inlined_call_operand.vmem [shape: f32[1,32], index: 1, kind: input, shape index: {}]   ;;  %s193_s2 = inlined_call_operand.vmem [shape: f32[1,32], index: 2, kind: input, shape index: {}]   ;;  %s194_s3 = inlined_call_operand.hbm [shape: f32[8,32], index: 3, kind: output, shape index: {}]  }
   0x1   :  { %9 = vsyncpa [#allocation4], 0  ;;  %s136_s12 = smov [#allocation2]   ;;  %s88_s16 = scalar_lea.hbm %s191_s0, 128 }
   0x2   :  { %s16_s13 = sshll.u32 %s136_s12, 4  ;;  %p89_p0 = scmp.ne.s32.totalorder %s191_s0, %s88_s16  ;;  %s17_s13 = int_to_ptr.vmem [resolvable:$true] %s16_s13 }
   0x3   :  { %p92_p1 = scmp.lt.u32.totalorder %s88_s16, %s191_s0 }
   0x5   :  { %p94_p2 = pnand %p92_p1, %p89_p0 }
   0x7   :  { %97 = shalt.err (!%p94_p2)
}
   0x8   :  { %s98_s21 = scalar_lea.vmem %s17_s13, 128  ;;  %p103_p4 = scmp.lt.s32.totalorder %s17_s13, %s17_s13 }
   0x9   :  { %p99_p3 = scmp.ne.s32.totalorder %s17_s13, %s98_s21  ;;  %p104_p5 = scmp.lt.s32.totalorder %s98_s21, %s98_s21 }
   0xb   :  { %p105_p6 = por %p104_p5, %p103_p4 }
   0xd   :  { %p106_p7 = pnand %p105_p6, %p99_p3 }
   0xf   :  { %109 = shalt.err (!%p106_p7)
}
  0x10   :  { %19 = dma.hbm_to_vmem [thread:$0]  %s191_s0, 128, %s17_s13, [#allocation3]  }
  0x11   :  { %132 = dma.done.wait [#allocation3], 128  }
  0x12   :  { %133 = vsyncadd [#allocation3], 4294967168  ;;  %vm28_vm0 = vcmask 261120   ;;  %v27_v0 = vld [vmem:[#allocation2] sm:$0xff]  ;;  %v56_v22 = vlaneseq  ;;  %s137_s27 = smov [#allocation5]  }
  0x13   :  { %v29_v1 = vsel %vm28_vm0, %v27_v0, 0.0  ;;  %v36_v2 = vmul.f32 %v27_v0, %v27_v0  ;;  %v51_v24 = vld [vmem:[%s192_s1] sm:$0x1]  ;;  %s75_s28 = sshll.u32 %s137_s27, 4  ;;  %s76_s28 = int_to_ptr.vmem [resolvable:$true] %s75_s28 }
  0x14   :  { %v30_v3 = vrot.slane %v29_v1, 4  ;;  %v57_v23 = vshrl.u32 %v56_v22, 7  ;;  %v52_v28 = vld [vmem:[%s193_s2] sm:$0x1]  ;;  %s110_s29 = scalar_lea.vmem %s76_s28, 128  ;;  %p115_p9 = scmp.lt.s32.totalorder %s76_s28, %s76_s28 }
  0x15   :  { %v37_v4 = vsel %vm28_vm0, %v36_v2, 0.0  ;;  %p111_p8 = scmp.ne.s32.totalorder %s76_s28, %s110_s29  ;;  %p116_p10 = scmp.lt.s32.totalorder %s110_s29, %s110_s29 }
  0x16   :  { %v31_v5 = vadd.f32 %v30_v3, %v29_v1  ;;  %v38_v6 = vrot.slane %v37_v4, 4  ;;  %v58_v25 = vsub.s32 0, %v57_v23 }
  0x17   :  { %p117_p11 = por %p116_p10, %p115_p9 }
  0x18   :  { %v32_v7 = vrot.slane %v31_v5, 2  ;;  %v39_v8 = vadd.f32 %v38_v6, %v37_v4 }
  0x19   :  { %p118_p12 = pnand %p117_p11, %p111_p8 }
  0x1a   :  { %v33_v9 = vadd.f32 %v32_v7, %v31_v5  ;;  %v40_v10 = vrot.slane %v39_v8, 2 }
  0x1c   :  { %v34_v11 = vrot.slane %v33_v9, 1  ;;  %v41_v12 = vadd.f32 %v40_v10, %v39_v8 }
  0x1e   :  { %v35_v13 = vadd.f32 %v34_v11, %v33_v9  ;;  %v42_v14 = vrot.slane %v41_v12, 1 }
  0x20   :  { %v43_v15 = vadd.f32 %v42_v14, %v41_v12  ;;  %v44_v16 = vmul.f32 0.125, %v35_v13 }
  0x22   :  { %v45_v17 = vmul.f32 0.125, %v43_v15  ;;  %v46_v18 = vmul.f32 %v44_v16, %v44_v16 }
  0x24   :  { %v47_v19 = vsub.f32 %v45_v17, %v46_v18 }
  0x26   :  { %v48_v20 = vmax.f32 %v47_v19, 0.0 }
  0x28   :  { %v49_v21 = vadd.f32 1e-05, %v48_v20 }
  0x2a   :  { %86 = vrsqrt.f32 %v49_v21 }
  0x34   :  { %v87_v26 = vpop.eup %86 }
  0x35   :  { %v53_v27 = vmul.f32 %v87_v26, %v51_v24 }
  0x37   :  { %v54_v29 = vmul.f32 %v53_v27, %v44_v16  ;;  %v59_v30 = vrot.slane %v53_v27, %v58_v25 }
  0x39   :  { %v55_v31 = vsub.f32 %v52_v28, %v54_v29  ;;  %v60_v32 = vmul.f32 %v59_v30, %v27_v0 }
  0x3b   :  { %v65_v33 = vrot.slane %v55_v31, %v58_v25 }
  0x3d   :  { %v67_v34 = vadd.f32 %v65_v33, %v60_v32 }
  0x3f   :  { %68 = vst.msk [vmem:[#allocation5] sm:$0xff] %vm28_vm0, %v67_v34 }
  0x40   :  { %121 = shalt.err (!%p118_p12)
}
  0x41   :  { %s122_s30 = scalar_lea.hbm %s194_s3, 128 }
  0x42   :  { %p123_p13 = scmp.ne.s32.totalorder %s194_s3, %s122_s30  ;;  %p126_p0 = scmp.lt.u32.totalorder %s122_s30, %s194_s3 }
  0x44   :  { %p128_p1 = pnand %p126_p0, %p123_p13 }
  0x46   :  { %131 = shalt.err (!%p128_p1)
}
  0x47   :  { %78 = dma.vmem_to_hbm [thread:$0]  %s76_s28, 128, %s194_s3, [#allocation4]  }
  0x48   :  { %134 = dma.done.wait [#allocation4], 128  }
  0x49   :  { %135 = vsyncadd [#allocation4], 4294967168 }
  0x4a   :  { %82 = vsyncpa [#allocation3], 1 }
  0x4b   :  { %83 = vsyncpa [#allocation4], 1 }

</bundles_post_ra>
